<compile_context>
chip_gen: v7x
topology: tpu7x:2x2x1
jax: 0.10.0
libtpu: 0.0.40
codegen_flags: <defaults>
</compile_context>

<pallas_src>
import functools

import jax
import jax.numpy as jnp
from jax import lax
from jax.experimental import pallas as pl
from jax.experimental.pallas import tpu as pltpu


def _stack9(act, m_top, m_bot, m_left, m_right, H, W):
    """Build the (9*Cin, H*W) stacked-tap operand of a 3x3 'SAME' conv.

    act: (Cin, H*W) f32, spatial flattened on the lane axis.
    Row order of the result is (dx, dy, cin), dx/dy in {0,1,2}.
    Only 4 rolls per stage: 2 row rolls, then 2 column rolls on the stacked
    (3*Cin, H*W) operand.  Masks are applied per roll stage; positions where
    the row mask is evaluated one column off are exactly the positions the
    column mask zeroes, so the composition equals the per-tap masked conv.
    """
    HW = H * W
    up = pltpu.roll(act, W, axis=1) * m_top            # reads p - W   (dy = 0)
    down = pltpu.roll(act, HW - W, axis=1) * m_bot     # reads p + W   (dy = 2)
    x3 = jnp.concatenate([up, act, down], axis=0)      # (3*Cin, HW), rows (dy, cin)
    left = pltpu.roll(x3, 1, axis=1) * m_left          # reads p - 1   (dx = 0)
    right = pltpu.roll(x3, HW - 1, axis=1) * m_right   # reads p + 1   (dx = 2)
    return jnp.concatenate([left, x3, right], axis=0)  # (9*Cin, HW), rows (dx, dy, cin)


def msrb_kernel(mask_ref, x_ref, wskip_ref, bskip_ref, w1_ref, b1_ref,
                w2_ref, b2_ref, w3_ref, b3_ref, out_ref, *, H, W, Bt):
    # Precomputed boundary masks (fetched once; constant index_map).
    m_top = mask_ref[0:1, :]      # row >= 1
    m_bot = mask_ref[1:2, :]      # row <= H-2
    m_left = mask_ref[2:3, :]     # col >= 1
    m_right = mask_ref[3:4, :]    # col <= W-2

    for img in range(Bt):         # static unroll; Bt is small
        x = x_ref[img]                                          # (Cin, HW) f32

        # 1x1 skip conv: single lane-dense channel matmul (bf16 operands,
        # f32 accumulation).
        skip = (jnp.dot(wskip_ref[...], x.astype(jnp.bfloat16),
                        preferred_element_type=jnp.float32)
                + bskip_ref[...])                               # (Cout, HW)

        # conv1 -> conv2 -> conv3: each stage is one fused matmul over the
        # stacked 9-tap operand, chained entirely in-register.
        x9 = _stack9(x, m_top, m_bot, m_left, m_right, H, W)
        c1 = (jnp.dot(w1_ref[...], x9.astype(jnp.bfloat16),
                      preferred_element_type=jnp.float32)
              + b1_ref[...])                                    # (C1, HW)

        x9 = _stack9(c1, m_top, m_bot, m_left, m_right, H, W)
        c2 = (jnp.dot(w2_ref[...], x9.astype(jnp.bfloat16),
                      preferred_element_type=jnp.float32)
              + b2_ref[...])                                    # (C2, HW)

        x9 = _stack9(c2, m_top, m_bot, m_left, m_right, H, W)
        c3 = (jnp.dot(w3_ref[...], x9.astype(jnp.bfloat16),
                      preferred_element_type=jnp.float32)
              + b3_ref[...])                                    # (C2, HW)

        # out = skip + concat([c1, c2, c3], channels): one dense, lane-dense,
        # full-sublane store (no partial channel-range stores).
        out = skip + jnp.concatenate([c1, c2, c3], axis=0)      # (Cout, HW)
        out_ref[img] = out.astype(out_ref.dtype)


def multiscale_residual_block(x_nchw, params):
    """x_nchw: (B, Cin, H, W) float32 -> (B, Cout, H, W) float32 (NCHW)."""
    wskip, bskip, w1, b1, w2, b2, w3, b3 = params
    B, Cin, H, W = x_nchw.shape
    C1 = w1.shape[-1]
    C2 = w2.shape[-1]
    Cout = C1 + 2 * C2
    HW = H * W
    assert wskip.shape == (Cin, Cout)

    # Images per grid step: amortize fixed per-step pipeline overhead while
    # keeping >= 2 parallel grid steps (v7x has 2 TensorCores) when possible.
    Bt = 2 if (B > 2 and B % 2 == 0) else 1
    assert B % Bt == 0

    # Free reshape: NCHW with spatial flattened on the (lane-dense) last dim.
    x_flat = x_nchw.reshape(B, Cin, HW).astype(jnp.float32)

    # Precompute boundary-validity masks once (tiny; DMA'd once, reused).
    pos = jnp.arange(HW, dtype=jnp.int32)
    row = pos // W
    col = pos % W
    masks = jnp.stack(
        [row >= 1, row <= H - 2, col >= 1, col <= W - 2], axis=0
    ).astype(jnp.float32)                                        # (4, HW)

    # Prepack weights for a single fused matmul per stage; bf16 operands.
    # Column order of the fused weight matches the (dx, dy, cin) row order of
    # the stacked operand built by _stack9.
    def pack3x3(w):  # (ky=dy, kx=dx, cin, cout) HWIO -> (cout, 9*cin)
        co = w.shape[-1]
        return jnp.transpose(w, (3, 1, 0, 2)).reshape(co, -1).astype(jnp.bfloat16)

    wskip_k = jnp.transpose(wskip, (1, 0)).astype(jnp.bfloat16)  # (Cout, Cin)
    w1_k, w2_k, w3_k = pack3x3(w1), pack3x3(w2), pack3x3(w3)
    bskip_k = bskip.reshape(Cout, 1).astype(jnp.float32)
    b1_k = b1.reshape(C1, 1).astype(jnp.float32)
    b2_k = b2.reshape(C2, 1).astype(jnp.float32)
    b3_k = b3.reshape(C2, 1).astype(jnp.float32)

    kernel = functools.partial(msrb_kernel, H=H, W=W, Bt=Bt)

    out_flat = pl.pallas_call(
        kernel,
        out_shape=jax.ShapeDtypeStruct((B, Cout, HW), jnp.float32),
        grid_spec=pltpu.PrefetchScalarGridSpec(
            num_scalar_prefetch=0,
            grid=(B // Bt,),
            in_specs=[
                pl.BlockSpec((4, HW), lambda b: (0, 0)),            # masks
                pl.BlockSpec((Bt, Cin, HW), lambda b: (b, 0, 0)),   # x
                pl.BlockSpec((Cout, Cin), lambda b: (0, 0)),        # skip w
                pl.BlockSpec((Cout, 1), lambda b: (0, 0)),          # skip b
                pl.BlockSpec((C1, 9 * Cin), lambda b: (0, 0)),      # conv1 w
                pl.BlockSpec((C1, 1), lambda b: (0, 0)),            # conv1 b
                pl.BlockSpec((C2, 9 * C1), lambda b: (0, 0)),       # conv2 w
                pl.BlockSpec((C2, 1), lambda b: (0, 0)),            # conv2 b
                pl.BlockSpec((C2, 9 * C2), lambda b: (0, 0)),       # conv3 w
                pl.BlockSpec((C2, 1), lambda b: (0, 0)),            # conv3 b
            ],
            out_specs=pl.BlockSpec((Bt, Cout, HW), lambda b: (b, 0, 0)),
        ),
        compiler_params=pltpu.CompilerParams(
            dimension_semantics=("parallel",)),
    )(masks, x_flat, wskip_k, bskip_k, w1_k, b1_k, w2_k, b2_k, w3_k, b3_k)

    # Free reshape back to NCHW.
    return out_flat.reshape(B, Cout, H, W)


def _ref_forward(x_nchw, params):
    """Pure-JAX reference (lax conv), NHWC/HWIO internally, NCHW in/out."""
    wskip, bskip, w1, b1, w2, b2, w3, b3 = params
    x = jnp.transpose(x_nchw, (0, 2, 3, 1)).astype(jnp.float32)
    dn = ('NHWC', 'HWIO', 'NHWC')

    def conv(inp, w, b):
        return lax.conv_general_dilated(
            inp, w, window_strides=(1, 1), padding='SAME',
            dimension_numbers=dn) + b

    skip = conv(x, wskip.reshape(1, 1, *wskip.shape), bskip)
    c1 = conv(x, w1, b1)
    c2 = conv(c1, w2, b2)
    c3 = conv(c2, w3, b3)
    out = skip + jnp.concatenate([c1, c2, c3], axis=-1)
    return jnp.transpose(out, (0, 3, 1, 2))


def _init_params(key, input_ch, output_ch):
    c1 = output_ch // 2
    c2 = output_ch // 4
    ks = jax.random.split(key, 8)
    scale = 0.1
    wskip = jax.random.normal(ks[0], (input_ch, output_ch), jnp.float32) * scale
    bskip = jax.random.normal(ks[1], (output_ch,), jnp.float32) * scale
    w1 = jax.random.normal(ks[2], (3, 3, input_ch, c1), jnp.float32) * scale
    b1 = jax.random.normal(ks[3], (c1,), jnp.float32) * scale
    w2 = jax.random.normal(ks[4], (3, 3, c1, c2), jnp.float32) * scale
    b2 = jax.random.normal(ks[5], (c2,), jnp.float32) * scale
    w3 = jax.random.normal(ks[6], (3, 3, c2, c2), jnp.float32) * scale
    b3 = jax.random.normal(ks[7], (c2,), jnp.float32) * scale
    return (wskip, bskip, w1, b1, w2, b2, w3, b3)


if __name__ == "__main__":
    key = jax.random.PRNGKey(0)
    kx, kp = jax.random.split(key)

    B, input_ch, output_ch, H, W = 2, 4, 8, 16, 16
    x = jax.random.normal(kx, (B, input_ch, H, W), jnp.float32)
    params = _init_params(kp, input_ch, output_ch)

    out = multiscale_residual_block(x, params)
    out = jax.block_until_ready(out)

    ref = _ref_forward(x, params)
    assert out.shape == (B, output_ch, H, W), out.shape
    # bf16 matmul operands with f32 accumulation -> slightly looser tolerance
    # than the pure-f32 path (per the performance review).
    max_err = float(jnp.max(jnp.abs(out - ref)))
    assert max_err < 5e-2, max_err

    print("KERNEL_OK")
</pallas_src>

<mosaic_0001>
module attributes {stable_mosaic.version = 11 : i64} {
  func.func @msrb_kernel(%arg0: i32, %arg1: memref<4x256xf32, #tpu.memory_space<vmem>>, %arg2: memref<1x4x256xf32, #tpu.memory_space<vmem>>, %arg3: memref<8x4xbf16, #tpu.memory_space<vmem>>, %arg4: memref<8x1xf32, #tpu.memory_space<vmem>>, %arg5: memref<4x36xbf16, #tpu.memory_space<vmem>>, %arg6: memref<4x1xf32, #tpu.memory_space<vmem>>, %arg7: memref<2x36xbf16, #tpu.memory_space<vmem>>, %arg8: memref<2x1xf32, #tpu.memory_space<vmem>>, %arg9: memref<2x18xbf16, #tpu.memory_space<vmem>>, %arg10: memref<2x1xf32, #tpu.memory_space<vmem>>, %arg11: memref<1x8x256xf32, #tpu.memory_space<vmem>>) attributes {dimension_semantics = [#tpu.dimension_semantics<parallel>], iteration_bounds = array<i64: 2>, scalar_prefetch = 0 : i64, scratch_operands = 0 : i64, tpu.core_type = #tpu.core_type<tc>, window_params = [{pipeline_mode = #tpu.pipeline_mode<synchronous>, transform_indices = @transform_0, window_bounds = array<i64: 4, 256>}, {transform_indices = @transform_1, window_bounds = array<i64: 1, 4, 256>}, {pipeline_mode = #tpu.pipeline_mode<synchronous>, transform_indices = @transform_2, window_bounds = array<i64: 8, 4>}, {pipeline_mode = #tpu.pipeline_mode<synchronous>, transform_indices = @transform_3, window_bounds = array<i64: 8, 1>}, {pipeline_mode = #tpu.pipeline_mode<synchronous>, transform_indices = @transform_4, window_bounds = array<i64: 4, 36>}, {pipeline_mode = #tpu.pipeline_mode<synchronous>, transform_indices = @transform_5, window_bounds = array<i64: 4, 1>}, {pipeline_mode = #tpu.pipeline_mode<synchronous>, transform_indices = @transform_6, window_bounds = array<i64: 2, 36>}, {pipeline_mode = #tpu.pipeline_mode<synchronous>, transform_indices = @transform_7, window_bounds = array<i64: 2, 1>}, {pipeline_mode = #tpu.pipeline_mode<synchronous>, transform_indices = @transform_8, window_bounds = array<i64: 2, 18>}, {pipeline_mode = #tpu.pipeline_mode<synchronous>, transform_indices = @transform_9, window_bounds = array<i64: 2, 1>}, {transform_indices = @transform_10, window_bounds = array<i64: 1, 8, 256>}]} {
    %c0 = arith.constant 0 : index
    %c0_0 = arith.constant 0 : index
    %0 = vector.load %arg1[%c0, %c0_0] : memref<4x256xf32, #tpu.memory_space<vmem>>, vector<1x256xf32>
    %c1 = arith.constant 1 : index
    %c0_1 = arith.constant 0 : index
    %1 = vector.load %arg1[%c1, %c0_1] : memref<4x256xf32, #tpu.memory_space<vmem>>, vector<1x256xf32>
    %c2 = arith.constant 2 : index
    %c0_2 = arith.constant 0 : index
    %2 = vector.load %arg1[%c2, %c0_2] : memref<4x256xf32, #tpu.memory_space<vmem>>, vector<1x256xf32>
    %c3 = arith.constant 3 : index
    %c0_3 = arith.constant 0 : index
    %3 = vector.load %arg1[%c3, %c0_3] : memref<4x256xf32, #tpu.memory_space<vmem>>, vector<1x256xf32>
    %c0_4 = arith.constant 0 : index
    %c0_5 = arith.constant 0 : index
    %c0_6 = arith.constant 0 : index
    %4 = vector.load %arg2[%c0_4, %c0_5, %c0_6] : memref<1x4x256xf32, #tpu.memory_space<vmem>>, vector<1x4x256xf32>
    %5 = vector.shape_cast %4 : vector<1x4x256xf32> to vector<4x256xf32>
    %c0_7 = arith.constant 0 : index
    %c0_8 = arith.constant 0 : index
    %6 = vector.load %arg3[%c0_7, %c0_8] : memref<8x4xbf16, #tpu.memory_space<vmem>>, vector<8x4xbf16>
    %7 = arith.truncf %5 : vector<4x256xf32> to vector<4x256xbf16>
    %cst = arith.constant dense<0.000000e+00> : vector<8x256xf32>
    %8 = tpu.matmul %6, %7, %cst {dimension_numbers = #tpu.dot_dimension_numbers<[1], [0], [0], [1], [0, 0, 1, 1], [], []>} : vector<8x4xbf16>, vector<4x256xbf16>, vector<8x256xf32> -> vector<8x256xf32>
    %c0_9 = arith.constant 0 : index
    %c0_10 = arith.constant 0 : index
    %9 = vector.load %arg4[%c0_9, %c0_10] : memref<8x1xf32, #tpu.memory_space<vmem>>, vector<8x1xf32>
    %10 = vector.broadcast %9 : vector<8x1xf32> to vector<8x256xf32>
    %11 = arith.addf %8, %10 : vector<8x256xf32>
    %c16_i32 = arith.constant 16 : i32
    %12 = tpu.dynamic_rotate %5 by %c16_i32 dim 1 : vector<4x256xf32>, i32 -> vector<4x256xf32>
    %13 = vector.broadcast %0 : vector<1x256xf32> to vector<4x256xf32>
    %14 = arith.mulf %12, %13 : vector<4x256xf32>
    %c240_i32 = arith.constant 240 : i32
    %15 = tpu.dynamic_rotate %5 by %c240_i32 dim 1 : vector<4x256xf32>, i32 -> vector<4x256xf32>
    %16 = vector.broadcast %1 : vector<1x256xf32> to vector<4x256xf32>
    %17 = arith.mulf %15, %16 : vector<4x256xf32>
    %18 = tpu.concatenate %14, %5, %17 in 0 : vector<4x256xf32>, vector<4x256xf32>, vector<4x256xf32> -> vector<12x256xf32>
    %c1_i32 = arith.constant 1 : i32
    %19 = tpu.dynamic_rotate %18 by %c1_i32 dim 1 : vector<12x256xf32>, i32 -> vector<12x256xf32>
    %20 = vector.broadcast %2 : vector<1x256xf32> to vector<12x256xf32>
    %21 = arith.mulf %19, %20 : vector<12x256xf32>
    %c255_i32 = arith.constant 255 : i32
    %22 = tpu.dynamic_rotate %18 by %c255_i32 dim 1 : vector<12x256xf32>, i32 -> vector<12x256xf32>
    %23 = vector.broadcast %3 : vector<1x256xf32> to vector<12x256xf32>
    %24 = arith.mulf %22, %23 : vector<12x256xf32>
    %25 = tpu.concatenate %21, %18, %24 in 0 : vector<12x256xf32>, vector<12x256xf32>, vector<12x256xf32> -> vector<36x256xf32>
    %c0_11 = arith.constant 0 : index
    %c0_12 = arith.constant 0 : index
    %26 = vector.load %arg5[%c0_11, %c0_12] : memref<4x36xbf16, #tpu.memory_space<vmem>>, vector<4x36xbf16>
    %27 = arith.truncf %25 : vector<36x256xf32> to vector<36x256xbf16>
    %cst_13 = arith.constant dense<0.000000e+00> : vector<4x256xf32>
    %28 = tpu.matmul %26, %27, %cst_13 {dimension_numbers = #tpu.dot_dimension_numbers<[1], [0], [0], [1], [0, 0, 1, 1], [], []>} : vector<4x36xbf16>, vector<36x256xbf16>, vector<4x256xf32> -> vector<4x256xf32>
    %c0_14 = arith.constant 0 : index
    %c0_15 = arith.constant 0 : index
    %29 = vector.load %arg6[%c0_14, %c0_15] : memref<4x1xf32, #tpu.memory_space<vmem>>, vector<4x1xf32>
    %30 = vector.broadcast %29 : vector<4x1xf32> to vector<4x256xf32>
    %31 = arith.addf %28, %30 : vector<4x256xf32>
    %c16_i32_16 = arith.constant 16 : i32
    %32 = tpu.dynamic_rotate %31 by %c16_i32_16 dim 1 : vector<4x256xf32>, i32 -> vector<4x256xf32>
    %33 = vector.broadcast %0 : vector<1x256xf32> to vector<4x256xf32>
    %34 = arith.mulf %32, %33 : vector<4x256xf32>
    %c240_i32_17 = arith.constant 240 : i32
    %35 = tpu.dynamic_rotate %31 by %c240_i32_17 dim 1 : vector<4x256xf32>, i32 -> vector<4x256xf32>
    %36 = vector.broadcast %1 : vector<1x256xf32> to vector<4x256xf32>
    %37 = arith.mulf %35, %36 : vector<4x256xf32>
    %38 = tpu.concatenate %34, %31, %37 in 0 : vector<4x256xf32>, vector<4x256xf32>, vector<4x256xf32> -> vector<12x256xf32>
    %c1_i32_18 = arith.constant 1 : i32
    %39 = tpu.dynamic_rotate %38 by %c1_i32_18 dim 1 : vector<12x256xf32>, i32 -> vector<12x256xf32>
    %40 = vector.broadcast %2 : vector<1x256xf32> to vector<12x256xf32>
    %41 = arith.mulf %39, %40 : vector<12x256xf32>
    %c255_i32_19 = arith.constant 255 : i32
    %42 = tpu.dynamic_rotate %38 by %c255_i32_19 dim 1 : vector<12x256xf32>, i32 -> vector<12x256xf32>
    %43 = vector.broadcast %3 : vector<1x256xf32> to vector<12x256xf32>
    %44 = arith.mulf %42, %43 : vector<12x256xf32>
    %45 = tpu.concatenate %41, %38, %44 in 0 : vector<12x256xf32>, vector<12x256xf32>, vector<12x256xf32> -> vector<36x256xf32>
    %c0_20 = arith.constant 0 : index
    %c0_21 = arith.constant 0 : index
    %46 = vector.load %arg7[%c0_20, %c0_21] : memref<2x36xbf16, #tpu.memory_space<vmem>>, vector<2x36xbf16>
    %47 = arith.truncf %45 : vector<36x256xf32> to vector<36x256xbf16>
    %cst_22 = arith.constant dense<0.000000e+00> : vector<2x256xf32>
    %48 = tpu.matmul %46, %47, %cst_22 {dimension_numbers = #tpu.dot_dimension_numbers<[1], [0], [0], [1], [0, 0, 1, 1], [], []>} : vector<2x36xbf16>, vector<36x256xbf16>, vector<2x256xf32> -> vector<2x256xf32>
    %c0_23 = arith.constant 0 : index
    %c0_24 = arith.constant 0 : index
    %49 = vector.load %arg8[%c0_23, %c0_24] : memref<2x1xf32, #tpu.memory_space<vmem>>, vector<2x1xf32>
    %50 = vector.broadcast %49 : vector<2x1xf32> to vector<2x256xf32>
    %51 = arith.addf %48, %50 : vector<2x256xf32>
    %c16_i32_25 = arith.constant 16 : i32
    %52 = tpu.dynamic_rotate %51 by %c16_i32_25 dim 1 : vector<2x256xf32>, i32 -> vector<2x256xf32>
    %53 = vector.broadcast %0 : vector<1x256xf32> to vector<2x256xf32>
    %54 = arith.mulf %52, %53 : vector<2x256xf32>
    %c240_i32_26 = arith.constant 240 : i32
    %55 = tpu.dynamic_rotate %51 by %c240_i32_26 dim 1 : vector<2x256xf32>, i32 -> vector<2x256xf32>
    %56 = vector.broadcast %1 : vector<1x256xf32> to vector<2x256xf32>
    %57 = arith.mulf %55, %56 : vector<2x256xf32>
    %58 = tpu.concatenate %54, %51, %57 in 0 : vector<2x256xf32>, vector<2x256xf32>, vector<2x256xf32> -> vector<6x256xf32>
    %c1_i32_27 = arith.constant 1 : i32
    %59 = tpu.dynamic_rotate %58 by %c1_i32_27 dim 1 : vector<6x256xf32>, i32 -> vector<6x256xf32>
    %60 = vector.broadcast %2 : vector<1x256xf32> to vector<6x256xf32>
    %61 = arith.mulf %59, %60 : vector<6x256xf32>
    %c255_i32_28 = arith.constant 255 : i32
    %62 = tpu.dynamic_rotate %58 by %c255_i32_28 dim 1 : vector<6x256xf32>, i32 -> vector<6x256xf32>
    %63 = vector.broadcast %3 : vector<1x256xf32> to vector<6x256xf32>
    %64 = arith.mulf %62, %63 : vector<6x256xf32>
    %65 = tpu.concatenate %61, %58, %64 in 0 : vector<6x256xf32>, vector<6x256xf32>, vector<6x256xf32> -> vector<18x256xf32>
    %c0_29 = arith.constant 0 : index
    %c0_30 = arith.constant 0 : index
    %66 = vector.load %arg9[%c0_29, %c0_30] : memref<2x18xbf16, #tpu.memory_space<vmem>>, vector<2x18xbf16>
    %67 = arith.truncf %65 : vector<18x256xf32> to vector<18x256xbf16>
    %cst_31 = arith.constant dense<0.000000e+00> : vector<2x256xf32>
    %68 = tpu.matmul %66, %67, %cst_31 {dimension_numbers = #tpu.dot_dimension_numbers<[1], [0], [0], [1], [0, 0, 1, 1], [], []>} : vector<2x18xbf16>, vector<18x256xbf16>, vector<2x256xf32> -> vector<2x256xf32>
    %c0_32 = arith.constant 0 : index
    %c0_33 = arith.constant 0 : index
    %69 = vector.load %arg10[%c0_32, %c0_33] : memref<2x1xf32, #tpu.memory_space<vmem>>, vector<2x1xf32>
    %70 = vector.broadcast %69 : vector<2x1xf32> to vector<2x256xf32>
    %71 = arith.addf %68, %70 : vector<2x256xf32>
    %72 = tpu.concatenate %31, %51, %71 in 0 : vector<4x256xf32>, vector<2x256xf32>, vector<2x256xf32> -> vector<8x256xf32>
    %73 = arith.addf %11, %72 : vector<8x256xf32>
    %c0_34 = arith.constant 0 : index
    %c0_35 = arith.constant 0 : index
    %c0_36 = arith.constant 0 : index
    %74 = vector.load %arg11[%c0_34, %c0_35, %c0_36] : memref<1x8x256xf32, #tpu.memory_space<vmem>>, vector<1x8x256xf32>
    %75 = vector.shape_cast %74 : vector<1x8x256xf32> to vector<8x256xf32>
    %76 = vector.shape_cast %73 : vector<8x256xf32> to vector<1x8x256xf32>
    tpu.vector_store %arg11[%c0_34, %c0_35, %c0_36], %76 {strides = array<i32>} : memref<1x8x256xf32, #tpu.memory_space<vmem>>, vector<1x8x256xf32>,
    return
  }
  func.func @transform_0(%arg0: i32) -> (i32, i32) {
    %c0_i32 = arith.constant 0 : i32
    %c0_i32_0 = arith.constant 0 : i32
    %c0_i32_1 = arith.constant 0 : i32
    return %c0_i32, %c0_i32_0 : i32, i32
  }
  func.func @transform_1(%arg0: i32) -> (i32, i32, i32) {
    %c0_i32 = arith.constant 0 : i32
    %c0_i32_0 = arith.constant 0 : i32
    %c0_i32_1 = arith.constant 0 : i32
    return %arg0, %c0_i32, %c0_i32_0 : i32, i32, i32
  }
  func.func @transform_2(%arg0: i32) -> (i32, i32) {
    %c0_i32 = arith.constant 0 : i32
    %c0_i32_0 = arith.constant 0 : i32
    %c0_i32_1 = arith.constant 0 : i32
    return %c0_i32, %c0_i32_0 : i32, i32
  }
  func.func @transform_3(%arg0: i32) -> (i32, i32) {
    %c0_i32 = arith.constant 0 : i32
    %c0_i32_0 = arith.constant 0 : i32
    %c0_i32_1 = arith.constant 0 : i32
    return %c0_i32, %c0_i32_0 : i32, i32
  }
  func.func @transform_4(%arg0: i32) -> (i32, i32) {
    %c0_i32 = arith.constant 0 : i32
    %c0_i32_0 = arith.constant 0 : i32
    %c0_i32_1 = arith.constant 0 : i32
    return %c0_i32, %c0_i32_0 : i32, i32
  }
  func.func @transform_5(%arg0: i32) -> (i32, i32) {
    %c0_i32 = arith.constant 0 : i32
    %c0_i32_0 = arith.constant 0 : i32
    %c0_i32_1 = arith.constant 0 : i32
    return %c0_i32, %c0_i32_0 : i32, i32
  }
  func.func @transform_6(%arg0: i32) -> (i32, i32) {
    %c0_i32 = arith.constant 0 : i32
    %c0_i32_0 = arith.constant 0 : i32
    %c0_i32_1 = arith.constant 0 : i32
    return %c0_i32, %c0_i32_0 : i32, i32
  }
  func.func @transform_7(%arg0: i32) -> (i32, i32) {
    %c0_i32 = arith.constant 0 : i32
    %c0_i32_0 = arith.constant 0 : i32
    %c0_i32_1 = arith.constant 0 : i32
    return %c0_i32, %c0_i32_0 : i32, i32
  }
  func.func @transform_8(%arg0: i32) -> (i32, i32) {
    %c0_i32 = arith.constant 0 : i32
    %c0_i32_0 = arith.constant 0 : i32
    %c0_i32_1 = arith.constant 0 : i32
    return %c0_i32, %c0_i32_0 : i32, i32
  }
  func.func @transform_9(%arg0: i32) -> (i32, i32) {
    %c0_i32 = arith.constant 0 : i32
    %c0_i32_0 = arith.constant 0 : i32
    %c0_i32_1 = arith.constant 0 : i32
    return %c0_i32, %c0_i32_0 : i32, i32
  }
  func.func @transform_10(%arg0: i32) -> (i32, i32, i32) {
    %c0_i32 = arith.constant 0 : i32
    %c0_i32_0 = arith.constant 0 : i32
    %c0_i32_1 = arith.constant 0 : i32
    return %arg0, %c0_i32, %c0_i32_0 : i32, i32, i32
  }
}

</mosaic_0001>

<bundles_post_ra>
// kernel: tpu_custom_call.1
= control target key start
LH: loop header
LB: loop body
LE: loop exit
PB: predicated region body
PF: predicated region fallthrough
CT: control target
= control target key end

     0   :  { %15 = vsyncpa [#allocation3], 0  ;;  %s1550_s0 = inlined_call_operand.vmem [shape: f32[4,256], index: 0, kind: input, shape index: {}]   ;;  %s1551_s1 = inlined_call_operand.vmem [shape: f32[2,4,256], index: 1, kind: input, shape index: {}]   ;;  %s1552_s2 = inlined_call_operand.vmem [shape: bf16[8,4], index: 2, kind: input, shape index: {}]   ;;  %s1553_s3 = inlined_call_operand.vmem [shape: f32[8,1], index: 3, kind: input, shape index: {}]   ;;  %s1554_s4 = inlined_call_operand.vmem [shape: bf16[4,36], index: 4, kind: input, shape index: {}]   ;;  %s1555_s5 = inlined_call_operand.vmem [shape: f32[4,1], index: 5, kind: input, shape index: {}]   ;;  %s1556_s6 = inlined_call_operand.vmem [shape: bf16[2,36], index: 6, kind: input, shape index: {}]   ;;  %s1557_s7 = inlined_call_operand.vmem [shape: f32[2,1], index: 7, kind: input, shape index: {}]   ;;  %s1558_s8 = inlined_call_operand.vmem [shape: bf16[2,18], index: 8, kind: input, shape index: {}]   ;;  %s1559_s9 = inlined_call_operand.vmem [shape: f32[2,1], index: 9, kind: input, shape index: {}]   ;;  %s1560_s10 = inlined_call_operand.hbm [shape: f32[2,8,256], index: 10, kind: output, shape index: {}]  }
   0x1   :  { %17 = vsyncpa [#allocation3 + $0x1], 0  ;;  %s1167_s13 = smov 0   ;;  %s1169_s14 = smov 0  }
   0x2   :  { %s1171_s15 = smov 0   ;;  %s1173_s16 = smov 0  }
   0x3 LB: > { %s1188_s17 = sadd.s32 4294967295, %s1104_s16   ;;  %s969_s18 = sadd.s32 4294967294, %s1104_s16   ;;  %s1104_s16 = sphi %s1173_s16, %s1566_s16   ;;  %s1100_s15 = sphi %s1171_s15, %s1565_s15   ;;  %s1096_s14 = sphi %s1169_s14, %s1564_s14   ;;  %s1092_s13 = sphi %s1167_s13, %s1563_s13  }
   0x4   : > { %s1192_s19 = sadd.s32 1, %s1104_s16   ;;  %s245_s20 = sadd.s32 1, %s1100_s15 }
   0x5   : > { %s242_s21 = ssub.s32 %s1104_s16, %s1192_s19  ;;  %p255_p0 = scmp.ne.s32.totalorder %s1100_s15, %s1096_s14 }
   0x6   : > { %p243_p1 = scmp.eq.s32.totalorder %s242_s21, 0  ;;  %p256_p2 = scmp.eq.s32.totalorder %s1188_s17, 1 }
   0x7   : > { %p261_p3 = scmp.ne.s32.totalorder %s1096_s14, %s1092_s13  ;;  %p262_p4 = scmp.eq.s32.totalorder %s969_s18, 1 }
   0x8   : > { %s1203_s22 = scalar_select %p243_p1, %s1100_s15, %s245_s20  }
   0x9   : > { %p1205_p5 = por %p256_p2, %p255_p0  ;;  %p1209_p6 = por %p262_p4, %p261_p3 }
   0xa   : > { %p972_p7 = scmp.ge.s32.totalorder %s1104_s16, 1  ;;  %p315_p8 = scmp.lt.s32.totalorder %s1104_s16, 3 }
   0xc   : > { %p316_p9 = pnand %p972_p7, %p315_p8 }
   0xd   : > { %p353_p10 = scmp.lt.s32.totalorder (!%p316_p9), %s1188_s17, 1  ;;  %s1106_s30 = smov (!%p316_p9), 112   ;;  %v435_v2 = vlaneseq (!%p316_p9)  ;;  %v976_v7 = vld [vmem:[%s1550_s0 + $0x1] ss:$4 sm:$0x3] (!%p316_p9)  ;;  %vm475_vm2 = vcmask (!%p316_p9), 1043456  }
   0xe   : > { %319 = sbr.rel (%p316_p9) target bundleno = 1466 (0x5ba), region = 60  ;;  %s1107_s11 = smov (!%p316_p9), 16   ;;  %v359_v8 = vld [vmem:[%s1550_s0] ss:$4 sm:$0x3] (!%p316_p9)  ;;  %v1109_v34 = vmov (!%p316_p9), 0  }
   0xf   : > { %v442_v3 = vshrl.u32 (!%p316_p9), %v435_v2, 7  ;;  %v1234_v4 = vand.u32 (!%p316_p9), 127, %v435_v2  ;;  %605 = vmatprep.mubr.bf16.mxu1 (!%p316_p9), %v1109_v34  ;;  %1038 = vset.pattern.permute.xlu0 (!%p316_p9), %v1109_v34  ;;  %v557_v35 = vld [vmem:[%s1555_s5] sm:$0xf] (!%p316_p9)  ;;  %vm383_vm5 = vcmask (!%p316_p9), 1041408   ;;  %vm563_vm6 = vcmask (!%p316_p9), 293888  }
  0x10   : > { %422 = vmatprep.mubr.bf16.mxu0 (!%p316_p9), %v1109_v34  ;;  %1039 = vset.pattern.permute.xlu1 (!%p316_p9), %v1109_v34  ;;  %v977_v36 = vld [vmem:[%s1550_s0 + $0x2] ss:$4 sm:$0x3] (!%p316_p9)  ;;  %v978_v45 = vld [vmem:[%s1550_s0 + $0x3] ss:$4 sm:$0x3] (!%p316_p9) }
  0x11   : > { %v1236_v5 = vsub.s32 (!%p316_p9), 0, %v442_v3  ;;  %v1238_v6 = vsub.s32 (!%p316_p9), 1, %v442_v3  ;;  %vm457_vm0 = vcmp.lt.s32.totalorder (!%p316_p9), %v1234_v4, 112  ;;  %vm437_vm1 = vcmp.lt.s32.totalorder (!%p316_p9), %v1234_v4, 16  ;;  %s993_s18 = sshll.u32 (!%p316_p9), %s1188_s17, 8 }
  0x12   : > { %vm486_vm3 = vcmp.lt.s32.totalorder (!%p316_p9), %v1234_v4, 1  ;;  %vm514_vm4 = vcmp.lt.s32.totalorder (!%p316_p9), %v1234_v4, 127  ;;  %vm379_vm7 = vcmask (!%p316_p9), 31744   ;;  %vm809_vm8 = vcmask (!%p316_p9), 1045504   ;;  %s1508_s27 = scalar_lea.hbm (!%p316_p9), %s1560_s10, %s993_s18 }
  0x13   : > { %v1249_v11 = vrot.slane (!%p316_p9), %v976_v7, %v1236_v5  ;;  %v1252_v12 = vrot.slane (!%p316_p9), %v976_v7, %v1238_v6  ;;  %v1255_v13 = vrot.slane (!%p316_p9), %v359_v8, %v1236_v5  ;;  %v1258_v14 = vrot.slane (!%p316_p9), %v359_v8, %v1238_v6 }
  0x14   : > { %v1299_v37 = vrot.slane (!%p316_p9), %v977_v36, %v1236_v5  ;;  %v1302_v38 = vrot.slane (!%p316_p9), %v977_v36, %v1238_v6  ;;  %v1320_v51 = vrot.slane (!%p316_p9), %v978_v45, %v1236_v5  ;;  %v1323_v52 = vrot.slane (!%p316_p9), %v978_v45, %v1238_v6 }
  0x15   : > { %s354_s25 = scalar_select %p353_p10, %s1188_s17, 1  ;;  %vm829_vm9 = vcmask 1040384   ;;  %vm825_vm10 = vcmask 146432  }
  0x17   : > { %s992_s26 = sshll.u32 %s354_s25, 3  ;;  %s1108_s25 = smov 1  }
  0x18   : > { %s357_s29 = scalar_lea.vmem %s1551_s1, %s992_s26  ;;  %s1110_s26 = smov 127  }
  0x19   : > { %v1220_v0 = vld [vmem:[%s357_s29] sm:$0xff]  ;;  %s350_s29 = sand.u32 1, %s1096_s14  }
  0x1a   : > { %453 = vrot.lane.b32.xlu1 %v1220_v0, %s1106_s30  ;;  %431 = vrot.lane.b32.xlu0 %v1220_v0, %s1107_s11  ;;  %v1228_v1 = vcombine.high %v1220_v0, %v1220_v0  ;;  %v473_v17 = vcombine.low %v1220_v0, %v1220_v0  ;;  %s973_s12 = sshll.u32 %s350_s29, 4  ;;  %s896_s17 = scalar_lea.sflag [#allocation3], %s350_s29 }
  0x1b   : > { %s352_s20 = scalar_lea.vmem [#allocation2], %s973_s12 }
  0x1c   : > { %s910_s21 = sshll.u32 %s352_s20, 4  ;;  %s1510_s21 = int_to_ptr.vmem [resolvable:$true] %s910_s21 }
  0x1d   : > { %s1042_s28 = scalar_lea.vmem %s1510_s21, 256 }
  0x1e   : > { %455 = vrot.lane.b32.xlu1 %v1228_v1, %s1106_s30  ;;  %433 = vrot.lane.b32.xlu0 %v1228_v1, %s1107_s11  ;;  %p1043_p11 = scmp.ne.s32.totalorder %s1510_s21, %s1042_s28 }
  0x20   : > { %p1044_p12 = pnand %p1043_p11, %p1205_p5 }
  0x22   : > { %p1045_p13 = pneg %p1044_p12 }
  0x8c   : > { %v454_v9 = vpop.permute.xlu1 %453  ;;  %v432_v10 = vpop.permute.xlu0 %431 }
  0x90   : > { %v456_v15 = vpop.permute.xlu1 %455  ;;  %v434_v16 = vpop.permute.xlu0 %433 }
  0x91   : > { %v458_v18 = vsel %vm457_vm0, %v454_v9, %v456_v15  ;;  %v459_v19 = vsel %vm457_vm0, %v456_v15, %v454_v9  ;;  %v438_v20 = vsel %vm437_vm1, %v432_v10, %v434_v16  ;;  %v439_v21 = vsel %vm437_vm1, %v434_v16, %v432_v10 }
  0x92   : > { %v471_v22 = vmul.f32 %v1249_v11, %v458_v18  ;;  %v472_v23 = vmul.f32 %v1252_v12, %v459_v19  ;;  %v451_v24 = vmul.f32 %v1255_v13, %v439_v21  ;;  %v452_v25 = vmul.f32 %v1258_v14, %v438_v20  ;;  %v550_v18 = vld [vmem:[%s1554_s4] sm:$0x3] }
  0x94   : > { %v540_v26 = vrot.slane %v471_v22, 4  ;;  %v542_v27 = vrot.slane %v472_v23, 4  ;;  %484 = vrot.lane.b32.xlu1 %v472_v23, %s1108_s25  ;;  %480 = vrot.lane.b32.xlu0 %v471_v22, %s1108_s25  ;;  %v476_v28 = vsel %vm475_vm2, %v451_v24, %v473_v17  ;;  %v477_v29 = vsel %vm475_vm2, %v452_v25, %v1220_v0 }
  0x95   : > { %v538_v30 = vrot.slane %v476_v28, 4  ;;  %v539_v31 = vrot.slane %v477_v29, 4 }
  0x97   : > { %v543_v32 = vsel %vm475_vm2, %v539_v31, %v542_v27  ;;  %v541_v33 = vsel %vm475_vm2, %v538_v30, %v540_v26  ;;  %v372_v27 = vpack.c.bf16 %v1228_v1, %v1228_v1 }
  0x98   : > { %478 = vrot.lane.b32.xlu0 %v476_v28, %s1108_s25  ;;  %482 = vrot.lane.b32.xlu1 %v477_v29, %s1108_s25 }
  0x99   : > { %979 = vmatprep.subr.msk.bf16.mxu0 %vm383_vm5, %v372_v27 }
  0x9c   : > { %506 = vrot.lane.b32.xlu0 %v476_v28, %s1110_s26  ;;  %510 = vrot.lane.b32.xlu1 %v477_v29, %s1110_s26  ;;  %v371_v28 = vpack.c.bf16 %v1220_v0, %v1220_v0 }
  0x9e   : > { %v385_v29 = vsel %vm383_vm5, %v371_v28, 0 }
  0x9f   : > { %391 = vmatpush1.bf16.msra.mxu0 %v385_v29 }
  0xa0   : > { %508 = vrot.lane.b32.xlu0 %v471_v22, %s1110_s26  ;;  %512 = vrot.lane.b32.xlu1 %v472_v23, %s1110_s26 }
  0xa4   : > { %560 = vperm.xlu0 %1038, %v557_v35  }
 0x106   : > { %v485_v39 = vpop.permute.xlu1 %484  ;;  %v481_v40 = vpop.permute.xlu0 %480 }
 0x107   : > { %v488_v41 = vsel %vm486_vm3, %v481_v40, %v485_v39  ;;  %v490_v42 = vsel %vm486_vm3, %v485_v39, %v481_v40 }
 0x108   : > { %v504_v43 = vmul.f32 %v1299_v37, %v490_v42  ;;  %v505_v44 = vmul.f32 %v1302_v38, %v488_v41 }
 0x10a   : > { %v483_v46 = vpop.permute.xlu1 %482  ;;  %v479_v47 = vpop.permute.xlu0 %478  ;;  %v549_v54 = vsel %vm475_vm2, %v505_v44, %v539_v31  ;;  %v548_v55 = vsel %vm475_vm2, %v504_v43, %v538_v30 }
 0x10b   : > { %v487_v48 = vsel %vm486_vm3, %v479_v47, %v483_v46  ;;  %v489_v49 = vsel %vm486_vm3, %v483_v46, %v479_v47 }
 0x10c   : > { %v502_v50 = vmul.f32 %v1299_v37, %v489_v49  ;;  %v503_v53 = vmul.f32 %v1302_v38, %v487_v48 }
 0x10e   : > { %v511_v56 = vpop.permute.xlu1 %510  ;;  %v507_v57 = vpop.permute.xlu0 %506  ;;  %v552_v58 = vpack.c.bf16 %v549_v54, %v503_v53  ;;  %v551_v59 = vpack.c.bf16 %v548_v55, %v502_v50  ;;  %v693_v54 = vld [vmem:[%s1557_s7] sm:$0x3] }
 0x10f   : > { %v515_v60 = vsel %vm514_vm4, %v507_v57, %v511_v56  ;;  %v517_v61 = vsel %vm514_vm4, %v511_v56, %v507_v57 }
 0x110   : > { %v530_v62 = vmul.f32 %v1320_v51, %v515_v60  ;;  %v531_v63 = vmul.f32 %v1323_v52, %v517_v61  ;;  %573 = vmatprep.subr.bf16.mxu1 %v552_v58 }
 0x111   : > { %574 = vmatpush1.bf16.msra.mxu1 %v551_v59 }
 0x112   : > { %v513_v2 = vpop.permute.xlu1 %512  ;;  %v509_v3 = vpop.permute.xlu0 %508  ;;  %v554_v5 = vpack.c.bf16 %v531_v63, %v543_v32  ;;  %v553_v6 = vpack.c.bf16 %v530_v62, %v541_v33  ;;  %v367_v33 = vld [vmem:[%s1552_s2] sm:$0xf] }
 0x113   : > { %v516_v7 = vsel %vm514_vm4, %v509_v3, %v513_v2  ;;  %v518_v8 = vsel %vm514_vm4, %v513_v2, %v509_v3  ;;  %980 = vmatmul.mubr.msk.bf16.vlgmr.msra.gmra.mrb[0].mxu0 %vm379_vm7, %v367_v33  ;;  %v686_v33 = vld [vmem:[%s1556_s6] sm:$0x1] }
 0x114   : > { %v532_v9 = vmul.f32 %v1320_v51, %v516_v7  ;;  %v533_v10 = vmul.f32 %v1323_v52, %v518_v8  ;;  %575 = vmatprep.subr.bf16.mxu1 %v554_v5  ;;  %740 = vmatprep.mubr.bf16.mxu0 %v1109_v34 }
 0x115   : > { %576 = vmatpush1.bf16.msra.mxu1 %v553_v6 }
 0x116   : > { %v555_v15 = vpack.c.bf16 %v532_v9, %v532_v9  ;;  %v556_v16 = vpack.c.bf16 %v533_v10, %v533_v10 }
 0x118   : > { %981 = vmatprep.subr.msk.bf16.mxu1 %vm383_vm5, %v556_v16  ;;  %v568_v17 = vsel %vm383_vm5, %v555_v15, 0 }
 0x119   : > { %578 = vmatpush1.bf16.msra.mxu1 %v568_v17 }
 0x11c   : > { %982 = vmatmul.mubr.msk.bf16.vlgmr.msra.gmra.mrb[0].mxu1 %vm563_vm6, %v550_v18 }
 0x11d   : > { %868 = vmatprep.mubr.bf16.mxu1 %v1109_v34 }
 0x123   : > { %v561_v19 = vpop.permute.xlu0 %560 }
 0x1ef   : > { %v607_v20 = vpop.f32.mrb[0].mxu1 }
 0x1f0   : > { %v1347_v21 = vadd.f32 %v607_v20, %v561_v19  ;;  %v609_v22 = vpop.f32.mrb[1].mxu1 }
 0x1f1   : > { %v611_v23 = vpop.f32.mrb[2].mxu1  ;;  %v1353_v25 = vadd.f32 %v609_v22, %v561_v19 }
 0x1f2   : > { %v612_v24 = vpop.f32.mrb[3].mxu1  ;;  %622 = vrot.lane.b32.xlu0 %v1347_v21, %s1106_s30  ;;  %614 = vrot.lane.b32.xlu1 %v1347_v21, %s1107_s11  ;;  %v632_v36 = vrot.slane %v1347_v21, 4 }
 0x1f3   : > { %v633_v35 = vrot.slane %v1353_v25, 4 }
 0x1f6   : > { %616 = vrot.lane.b32.xlu1 %v1353_v25, %s1107_s11 }
 0x1fa   : > { %624 = vrot.lane.b32.xlu1 %v1353_v25, %s1106_s30 }
 0x264   : > { %v615_v26 = vpop.permute.xlu1 %614  ;;  %v623_v39 = vpop.permute.xlu0 %622 }
 0x268   : > { %v617_v30 = vpop.permute.xlu1 %616 }
 0x269   : > { %v618_v31 = vsel %vm437_vm1, %v615_v26, %v617_v30  ;;  %v619_v32 = vsel %vm437_vm1, %v617_v30, %v615_v26 }
 0x26a   : > { %v620_v1 = vmul.f32 %v619_v32, %v1255_v13  ;;  %v621_v0 = vmul.f32 %v618_v31, %v1258_v14 }
 0x26c   : > { %v625_v40 = vpop.permute.xlu1 %624  ;;  %v637_v43 = vsel %vm475_vm2, %v621_v0, %v633_v35  ;;  %v636_v44 = vsel %vm475_vm2, %v620_v1, %v632_v36  ;;  %v1430_v1 = vpop.f32.mrb[0].mxu0 }
 0x26d   : > { %v626_v41 = vsel %vm457_vm0, %v623_v39, %v625_v40  ;;  %v627_v42 = vsel %vm457_vm0, %v625_v40, %v623_v39  ;;  %v675_v34 = vrot.slane %v637_v43, 4  ;;  %v674_v49 = vrot.slane %v636_v44, 4  ;;  %v1432_v0 = vpop.f32.mrb[1].mxu0 }
 0x26e   : > { %v628_v45 = vmul.f32 %v626_v41, %v1249_v11  ;;  %v629_v46 = vmul.f32 %v627_v42, %v1252_v12  ;;  %v428_v35 = vpop.f32.mrb[2].mxu0 }
 0x26f   : > { %v429_v36 = vpop.f32.mrb[3].mxu0 }
 0x270   : > { %v676_v47 = vrot.slane %v628_v45, 4  ;;  %v678_v48 = vrot.slane %v629_v46, 4  ;;  %644 = vrot.lane.b32.xlu1 %v629_v46, %s1108_s25  ;;  %640 = vrot.lane.b32.xlu0 %v628_v45, %s1108_s25 }
 0x272   : > { %v677_v50 = vsel %vm475_vm2, %v674_v49, %v676_v47  ;;  %v679_v53 = vsel %vm475_vm2, %v675_v34, %v678_v48 }
 0x274   : > { %642 = vrot.lane.b32.xlu1 %v637_v43, %s1108_s25  ;;  %638 = vrot.lane.b32.xlu0 %v636_v44, %s1108_s25 }
 0x278   : > { %658 = vrot.lane.b32.xlu1 %v637_v43, %s1110_s26  ;;  %654 = vrot.lane.b32.xlu0 %v636_v44, %s1110_s26 }
 0x27c   : > { %660 = vrot.lane.b32.xlu1 %v629_v46, %s1110_s26  ;;  %656 = vrot.lane.b32.xlu0 %v628_v45, %s1110_s26 }
 0x280   : > { %696 = vperm.xlu0 %1038, %v693_v54  }
 0x2e2   : > { %v645_v55 = vpop.permute.xlu1 %644  ;;  %v641_v56 = vpop.permute.xlu0 %640 }
 0x2e3   : > { %v647_v57 = vsel %vm486_vm3, %v641_v56, %v645_v55  ;;  %v649_v58 = vsel %vm486_vm3, %v645_v55, %v641_v56 }
 0x2e4   : > { %v652_v59 = vmul.f32 %v649_v58, %v1299_v37  ;;  %v653_v60 = vmul.f32 %v647_v57, %v1302_v38 }
 0x2e6   : > { %v643_v61 = vpop.permute.xlu1 %642  ;;  %v639_v62 = vpop.permute.xlu0 %638  ;;  %v684_v6 = vsel %vm475_vm2, %v652_v59, %v674_v49  ;;  %v685_v7 = vsel %vm475_vm2, %v653_v60, %v675_v34 }
 0x2e7   : > { %v646_v63 = vsel %vm486_vm3, %v639_v62, %v643_v61  ;;  %v648_v2 = vsel %vm486_vm3, %v643_v61, %v639_v62 }
 0x2e8   : > { %v650_v3 = vmul.f32 %v648_v2, %v1299_v37  ;;  %v651_v5 = vmul.f32 %v646_v63, %v1302_v38 }
 0x2ea   : > { %v687_v8 = vpack.c.bf16 %v684_v6, %v650_v3  ;;  %v659_v9 = vpop.permute.xlu1 %658  ;;  %v655_v10 = vpop.permute.xlu0 %654  ;;  %v688_v15 = vpack.c.bf16 %v685_v7, %v651_v5 }
 0x2eb   : > { %v662_v16 = vsel %vm514_vm4, %v655_v10, %v659_v9  ;;  %v664_v17 = vsel %vm514_vm4, %v659_v9, %v655_v10 }
 0x2ec   : > { %v666_v18 = vmul.f32 %v662_v16, %v1320_v51  ;;  %v667_v19 = vmul.f32 %v664_v17, %v1323_v52  ;;  %708 = vmatprep.subr.bf16.mxu0 %v688_v15 }
 0x2ed   : > { %709 = vmatpush1.bf16.msra.mxu0 %v687_v8 }
 0x2ee   : > { %v689_v20 = vpack.c.bf16 %v666_v18, %v677_v50  ;;  %v661_v22 = vpop.permute.xlu1 %660  ;;  %v657_v23 = vpop.permute.xlu0 %656  ;;  %v690_v24 = vpack.c.bf16 %v667_v19, %v679_v53 }
 0x2ef   : > { %v663_v26 = vsel %vm514_vm4, %v657_v23, %v661_v22  ;;  %v665_v27 = vsel %vm514_vm4, %v661_v22, %v657_v23 }
 0x2f0   : > { %v668_v28 = vmul.f32 %v663_v26, %v1320_v51  ;;  %v669_v29 = vmul.f32 %v665_v27, %v1323_v52  ;;  %710 = vmatprep.subr.bf16.mxu0 %v690_v24 }
 0x2f1   : > { %711 = vmatpush1.bf16.msra.mxu0 %v689_v20 }
 0x2f2   : > { %v691_v30 = vpack.c.bf16 %v668_v28, %v668_v28  ;;  %v692_v31 = vpack.c.bf16 %v669_v29, %v669_v29 }
 0x2f4   : > { %983 = vmatprep.subr.msk.bf16.mxu0 %vm383_vm5, %v692_v31  ;;  %v703_v32 = vsel %vm383_vm5, %v691_v30, 0 }
 0x2f5   : > { %713 = vmatpush1.bf16.msra.mxu0 %v703_v32 }
 0x2f8   : > { %984 = vmatmul.mubr.msk.bf16.vlgmr.msra.gmra.mrb[4].mxu0 %vm563_vm6, %v686_v33 }
 0x2ff   : > { %v697_v39 = vpop.permute.xlu0 %696 }
 0x3cb   : > { %v742_v40 = vpop.f32.mrb[4].mxu0 }
 0x3cc   : > { %v1434_v41 = vadd.f32 %v742_v40, %v697_v39  ;;  %v744_v42 = vpop.f32.mrb[5].mxu0 }
 0x3cd   : > { %v1436_v43 = vadd.f32 %v744_v42, %v697_v39  ;;  %v746_v44 = vpop.f32.mrb[6].mxu0 }
 0x3ce   : > { %v747_v45 = vpop.f32.mrb[7].mxu0  ;;  %757 = vrot.lane.b32.xlu1 %v1434_v41, %s1106_s30  ;;  %v767_v60 = vrot.slane %v1434_v41, 6  ;;  %v877_v32 = vrot.slane %v1434_v41, 4 }
 0x3cf   : > { %759 = vrot.lane.b32.xlu0 %v1436_v43, %s1106_s30  ;;  %v768_v59 = vrot.slane %v1436_v43, 6  ;;  %v878_v35 = vrot.slane %v1436_v43, 4 }
 0x3d2   : > { %749 = vrot.lane.b32.xlu1 %v1434_v41, %s1107_s11 }
 0x3d3   : > { %751 = vrot.lane.b32.xlu0 %v1436_v43, %s1107_s11 }
 0x440   : > { %v758_v46 = vpop.permute.xlu1 %757 }
 0x441   : > { %v760_v47 = vpop.permute.xlu0 %759 }
 0x442   : > { %v761_v48 = vsel %vm457_vm0, %v758_v46, %v760_v47  ;;  %v762_v34 = vsel %vm457_vm0, %v760_v47, %v758_v46 }
 0x443   : > { %v763_v49 = vmul.f32 %v761_v48, %v1249_v11  ;;  %v764_v50 = vmul.f32 %v762_v34, %v1252_v12  ;;  %v887_v48 = vsel %vm475_vm2, %v1347_v21, %v877_v32 }
 0x444   : > { %v750_v53 = vpop.permute.xlu1 %749 }
 0x445   : > { %v752_v54 = vpop.permute.xlu0 %751  ;;  %v773_v61 = vrot.slane %v763_v49, 4  ;;  %v774_v11 = vrot.slane %v764_v50, 4  ;;  %v888_v49 = vsel %vm475_vm2, %v1353_v25, %v878_v35 }
 0x446   : > { %v753_v55 = vsel %vm437_vm1, %v750_v53, %v752_v54  ;;  %v754_v56 = vsel %vm437_vm1, %v752_v54, %v750_v53 }
 0x447   : > { %v755_v57 = vmul.f32 %v754_v56, %v1255_v13  ;;  %v756_v58 = vmul.f32 %v753_v55, %v1258_v14  ;;  %v373_v13 = vld [vmem:[%s1553_s3] sm:$0xff] }
 0x448   : > { %v819_v14 = vld [vmem:[%s1559_s9] sm:$0x3] }
 0x449   : > { %v778_v12 = vsel %vm383_vm5, %v756_v58, %v768_v59  ;;  %v777_v62 = vsel %vm383_vm5, %v755_v57, %v767_v60 }
 0x44a   : > { %v780_v63 = vsel %vm475_vm2, %v778_v12, %v774_v11  ;;  %v779_v2 = vsel %vm475_vm2, %v777_v62, %v773_v61 }
 0x44b   : > { %791 = vrot.lane.b32.xlu0 %v780_v63, %s1110_s26  ;;  %789 = vrot.lane.b32.xlu1 %v779_v2, %s1110_s26  ;;  %v799_v20 = vrot.slane %v779_v2, 2  ;;  %v800_v23 = vrot.slane %v780_v63, 2 }
 0x44f   : > { %783 = vrot.lane.b32.xlu0 %v780_v63, %s1108_s25  ;;  %781 = vrot.lane.b32.xlu1 %v779_v2, %s1108_s25  ;;  %s1111_s25 = smov [#allocation2]  }
 0x450   : > { %s1046_s26 = sshll.u32 %s1111_s25, 4  ;;  %s1047_s26 = int_to_ptr.vmem [resolvable:$false] %s1046_s26 }
 0x451   : > { %s1048_s12 = scalar_lea.vmem %s1047_s26, 512  ;;  %p1049_p0 = scmp.lt.s32.totalorder %s1510_s21, %s1047_s26 }
 0x452   : > { %p1050_p1 = scmp.lt.s32.totalorder %s1048_s12, %s1042_s28 }
 0x453   : > { %376 = vperm.xlu0 %1038, %v373_v13   ;;  %822 = vperm.xlu1 %1039, %v819_v14  }
 0x454   : > { %p1051_p2 = por %p1050_p1, %p1049_p0 }
 0x456   : > { %p1052_p3 = pnand %p1051_p2, %p1045_p13 }
 0x4bd   : > { %v792_v3 = vpop.permute.xlu0 %791  ;;  %v790_v5 = vpop.permute.xlu1 %789 }
 0x4be   : > { %v793_v6 = vsel %vm514_vm4, %v790_v5, %v792_v3  ;;  %v794_v7 = vsel %vm514_vm4, %v792_v3, %v790_v5 }
 0x4bf   : > { %v795_v8 = vmul.f32 %v793_v6, %v1320_v51  ;;  %v796_v9 = vmul.f32 %v794_v7, %v1323_v52 }
 0x4c1   : > { %v805_v10 = vrot.slane %v795_v8, 4  ;;  %v784_v15 = vpop.permute.xlu0 %783  ;;  %v782_v16 = vpop.permute.xlu1 %781  ;;  %v806_v17 = vrot.slane %v796_v9, 4 }
 0x4c2   : > { %v785_v18 = vsel %vm486_vm3, %v782_v16, %v784_v15  ;;  %v786_v19 = vsel %vm486_vm3, %v784_v15, %v782_v16 }
 0x4c3   : > { %v787_v22 = vmul.f32 %v786_v19, %v1299_v37  ;;  %v788_v24 = vmul.f32 %v785_v18, %v1302_v38  ;;  %v812_v51 = vsel %vm475_vm2, %v799_v20, %v805_v10  ;;  %v813_v27 = vsel %vm475_vm2, %v800_v23, %v806_v17  ;;  %v814_v38 = vld [vmem:[%s1558_s8] sm:$0x1] }
 0x4c4   : > { %v817_v30 = vpack.c.bf16 %v805_v10, %v805_v10  ;;  %v818_v4 = vpack.c.bf16 %v806_v17, %v806_v17 }
 0x4c5   : > { %v810_v52 = vsel %vm809_vm8, %v787_v22, %v799_v20  ;;  %v811_v26 = vsel %vm809_vm8, %v788_v24, %v800_v23 }
 0x4c6   : > { %v815_v28 = vpack.c.bf16 %v812_v51, %v810_v52  ;;  %v816_v29 = vpack.c.bf16 %v813_v27, %v811_v26  ;;  %v831_v37 = vsel %vm829_vm9, %v817_v30, 0 }
 0x4c8   : > { %836 = vmatprep.subr.bf16.mxu1 %v816_v29 }
 0x4c9   : > { %837 = vmatpush1.bf16.msra.mxu1 %v815_v28 }
 0x4ca   : > { %985 = vmatprep.subr.msk.bf16.mxu1 %vm829_vm9, %v818_v4 }
 0x4cd   : > { %839 = vmatpush1.bf16.msra.mxu1 %v831_v37 }
 0x4d0   : > { %986 = vmatmul.mubr.msk.bf16.vlgmr.msra.gmra.mrb[4].mxu1 %vm825_vm10, %v814_v38 }
 0x4d2   : > { %v823_v31 = vpop.permute.xlu1 %822  ;;  %v377_v36 = vpop.permute.xlu0 %376 }
 0x4d3   : > { %v425_v47 = vadd.f32 %v1430_v1, %v377_v36  ;;  %v427_v41 = vadd.f32 %v1432_v0, %v377_v36 }
 0x5a3   : > { %v870_v33 = vpop.f32.mrb[4].mxu1 }
 0x5a4   : > { %v871_v39 = vadd.f32 %v870_v33, %v823_v31  ;;  %v872_v40 = vpop.f32.mrb[5].mxu1 }
 0x5a5   : > { %v873_v42 = vadd.f32 %v872_v40, %v823_v31  ;;  %v874_v44 = vpop.f32.mrb[6].mxu1 }
 0x5a6   : > { %v883_v45 = vrot.slane %v871_v39, 2  ;;  %v875_v46 = vpop.f32.mrb[7].mxu1 }
 0x5a7   : > { %v884_v34 = vrot.slane %v873_v42, 2 }
 0x5a8   : > { %v889_v43 = vsel %vm809_vm8, %v887_v48, %v883_v45 }
 0x5a9   : > { %v891_v50 = vadd.f32 %v889_v43, %v425_v47  ;;  %v890_v53 = vsel %vm809_vm8, %v888_v49, %v884_v34 }
 0x5aa   : > { %v892_v54 = vadd.f32 %v890_v53, %v427_v41 }
 0x5ab   : > { %893 = vst [vmem:[%s352_s20] sm:$0xff] %v891_v50 }
 0x5ac   : > { %894 = vst [vmem:[%s352_s20 + $0x8] sm:$0xff] %v892_v54 }
 0x5ad   : > { %1055 = shalt.err (!%p1052_p3)
}
 0x5ae   : > { %s1056_s29 = scalar_lea.hbm %s1508_s27, 256  ;;  %s1060_s30 = scalar_lea.hbm %s1560_s10, 512 }
 0x5af   : > { %p1057_p4 = scmp.ne.s32.totalorder %s1508_s27, %s1056_s29  ;;  %p1061_p9 = scmp.lt.u32.totalorder %s1508_s27, %s1560_s10 }
 0x5b0   : > { %p1062_p10 = scmp.lt.u32.totalorder %s1060_s30, %s1056_s29  ;;  %p1064_p12 = scmp.lt.u32.totalorder %s1056_s29, %s1508_s27 }
 0x5b1   : > { %p1058_p7 = pnand %p1057_p4, %p1205_p5 }
 0x5b2   : > { %p1063_p11 = por %p1062_p10, %p1061_p9 }
 0x5b3   : > { %p1059_p8 = pneg %p1058_p7 }
 0x5b4   : > { %p1065_p13 = por %p1064_p12, %p1063_p11 }
 0x5b6   : > { %p1066_p0 = pnand %p1065_p13, %p1059_p8 }
 0x5b8   : > { %1069 = shalt.err (!%p1066_p0)
}
 0x5b9   : > { %994 = dma.vmem_to_hbm [thread:$0]  (%p1205_p5), %s1510_s21, 256, %s1508_s27, %s896_s17  }
 0x5ba PF: > { %p1000_p1 = scmp.ge.s32.totalorder %s1104_s16, 2  ;;  %s922_s28 = sand.u32 1, %s1092_s13  }
 0x5bb   : > { %s923_s26 = scalar_lea.sflag [#allocation3], %s922_s28 }
 0x5bc   : > { %p997_p2 = pnand %p1000_p1, %p1209_p6 }
 0x5be   : > { %1087 = dma.done.wait (!%p997_p2), %s923_s26, 256  }
 0x5bf   : > { %1089 = vsyncadd (!%p997_p2), %s923_s26, 4294967040  ;;  %p20_p3 = scmp.ge.s32.totalorder %s1192_s19, 4   ;;  %s1563_s13 = smov %s1096_s14 }
 0x5c0   : > { %s1564_s14 = smov %s1100_s15  ;;  %s1565_s15 = smov %s1203_s22 }
 0x5c1   : > { %s1566_s16 = smov %s1192_s19  ;;  %22 = sbr.rel (!%p20_p3) target bundleno = 3 (0x3), region = 98 }
 0x5c8   :  { %928 = vsyncpa [#allocation3], 1 }
 0x5c9   :  { %930 = vsyncpa [#allocation3 + $0x1], 1 }

</bundles_post_ra>
